<compile_context>
chip_gen: v7x
topology: tpu7x:2x2x1
jax: 0.10.0
libtpu: 0.0.40
codegen_flags: <defaults>
</compile_context>

<pallas_src>
import jax
import jax.numpy as jnp
from jax.experimental import pallas as pl
from jax.experimental.pallas import tpu as pltpu

EPS = 1e-5


# ----------------------------- kernels --------------------------------------

def _block_identity_kernel(x_ref, w1_ref, b1_ref, w2_ref, b2_ref, o_ref):
    """inplanes == planes: identity shortcut.

    x_ref:  (C, t) f32      w1_ref/w2_ref: (C, C) bf16 (BN scale pre-folded)
    b1_ref/b2_ref: (C, 1) f32 shifts       o_ref: (C, t) f32
    """
    x32 = x_ref[...]                               # f32 residual path
    x = x32.astype(jnp.bfloat16)                   # bf16 MXU operand
    h = jnp.dot(w1_ref[...], x, preferred_element_type=jnp.float32) + b1_ref[...]
    h = jnp.maximum(h, 0.0)
    h = jnp.dot(w2_ref[...], h.astype(jnp.bfloat16),
                preferred_element_type=jnp.float32) + b2_ref[...]
    o_ref[...] = jnp.maximum(h + x32, 0.0).astype(o_ref.dtype)


def _block_shortcut_kernel(x_ref, wcat_ref, bcat_ref, w2_ref, b2_ref, o_ref):
    """inplanes != planes: 1x1-conv + BN shortcut, fused with conv1.

    wcat_ref: (2*C_out, C_in) bf16 = [w1*s1 ; wsc*ssc]   bcat_ref: (2*C_out, 1) f32
    """
    c_out = w2_ref.shape[0]
    x = x_ref[...].astype(jnp.bfloat16)
    # One MXU pass over x produces both the conv1 result and the shortcut.
    hcat = jnp.dot(wcat_ref[...], x, preferred_element_type=jnp.float32) + bcat_ref[...]
    h = jnp.maximum(hcat[:c_out, :], 0.0)          # conv1 + bn1 + relu
    idn = hcat[c_out:, :]                          # shortcut conv + bn (sublane split)
    h = jnp.dot(w2_ref[...], h.astype(jnp.bfloat16),
                preferred_element_type=jnp.float32) + b2_ref[...]
    o_ref[...] = jnp.maximum(h + idn, 0.0).astype(o_ref.dtype)


# ----------------------------- glue / wrapper --------------------------------

def _fold_bn(gamma, beta, mean, var, eps=EPS):
    scale = (gamma / jnp.sqrt(var + eps)).astype(jnp.float32)
    shift = (beta - mean * scale).astype(jnp.float32)
    return scale, shift                                   # (C,), (C,)


def _pick_tile(hw, c_in, c_out, n, budget_bytes=12 * 1024 * 1024):
    """Largest lane tile over the flattened spatial axis that divides HW, is a
    multiple of 128 (or the full extent), and keeps the double-buffered f32
    in/out blocks under a VMEM budget safe on v5e/v6e/v7x."""
    if hw % 128 != 0:
        return hw                                          # full-extent block is allowed
    per_col = 2 * 2 * (c_in + c_out) * 4                   # 2 bufs x (in+out) x f32 bytes
    t_cap = max(128, (budget_bytes // per_col) // 128 * 128)
    t = min(hw, t_cap, 2048)
    while hw % t != 0:
        t -= 128
    # Keep >=2 grid steps so both v7x TensorCores get work.
    if n * (hw // t) < 2 and t % 256 == 0:
        t //= 2
    return t


def basic_block_forward(x_nchw, params):
    """BasicBlock forward pass (inference-mode BN) with a Pallas kernel.

    x_nchw: (N, C_in, H, W) float32
    params: dict with conv weights (PyTorch layout (out, in, 1, 1)) and BN params.
    """
    N, C_in, H, W = x_nchw.shape
    C_out = params["w1"].shape[0]
    HW = H * W

    # NCHW -> (N, C, H*W): a pure reshape, no transpose / extra HBM pass.
    x3 = x_nchw.reshape(N, C_in, HW)

    # (out, in, 1, 1) -> (out, in); fold BN scale into weight rows, keep shifts.
    w1 = params["w1"].reshape(C_out, C_in).astype(jnp.float32)
    w2 = params["w2"].reshape(C_out, C_out).astype(jnp.float32)
    s1, b1 = _fold_bn(params["bn1_g"], params["bn1_b"], params["bn1_m"], params["bn1_v"])
    s2, b2 = _fold_bn(params["bn2_g"], params["bn2_b"], params["bn2_m"], params["bn2_v"])
    w1s = (w1 * s1[:, None]).astype(jnp.bfloat16)
    w2s = (w2 * s2[:, None]).astype(jnp.bfloat16)
    b1c = b1.reshape(C_out, 1)
    b2c = b2.reshape(C_out, 1)

    use_shortcut = (C_in != C_out)

    t = _pick_tile(HW, C_in, C_out, N)
    grid = (N, HW // t)

    # Batch dim is squeezed out of the kernel view; spatial tile is lane-dense.
    x_spec = pl.BlockSpec((None, C_in, t), lambda n, j: (n, 0, j))
    o_spec = pl.BlockSpec((None, C_out, t), lambda n, j: (n, 0, j))

    def full2d(r, c):
        # Grid-invariant operand: same block every step (stays resident in VMEM).
        return pl.BlockSpec((r, c), lambda n, j: (0, 0))

    if use_shortcut:
        wsc = params["wsc"].reshape(C_out, C_in).astype(jnp.float32)
        ssc, bsc = _fold_bn(params["bnsc_g"], params["bnsc_b"],
                            params["bnsc_m"], params["bnsc_v"])
        wscs = (wsc * ssc[:, None]).astype(jnp.bfloat16)
        wcat = jnp.concatenate([w1s, wscs], axis=0)        # (2*C_out, C_in) bf16
        bcat = jnp.concatenate([b1c, bsc.reshape(C_out, 1)], axis=0)  # (2*C_out, 1) f32
        in_specs = [x_spec,
                    full2d(2 * C_out, C_in), full2d(2 * C_out, 1),
                    full2d(C_out, C_out), full2d(C_out, 1)]
        args = (x3, wcat, bcat, w2s, b2c)
        kernel = _block_shortcut_kernel
    else:
        in_specs = [x_spec,
                    full2d(C_out, C_in), full2d(C_out, 1),
                    full2d(C_out, C_out), full2d(C_out, 1)]
        args = (x3, w1s, b1c, w2s, b2c)
        kernel = _block_identity_kernel

    out3 = pl.pallas_call(
        kernel,
        out_shape=jax.ShapeDtypeStruct((N, C_out, HW), jnp.float32),
        grid_spec=pltpu.PrefetchScalarGridSpec(
            num_scalar_prefetch=0,
            grid=grid,
            in_specs=in_specs,
            out_specs=o_spec,
        ),
        compiler_params=pltpu.CompilerParams(
            dimension_semantics=("parallel", "parallel"),
            vmem_limit_bytes=32 * 1024 * 1024),
    )(*args)

    # (N, C_out, H*W) -> NCHW: free reshape.
    return out3.reshape(N, C_out, H, W)


# ----------------------------- reference (pure JAX, f32) ----------------------

def basic_block_reference(x_nchw, params):
    N, C_in, H, W = x_nchw.shape
    C_out = params["w1"].shape[0]
    x = x_nchw.reshape(N, C_in, H * W).astype(jnp.float32)
    w1 = params["w1"].reshape(C_out, C_in)
    w2 = params["w2"].reshape(C_out, C_out)
    s1, b1 = _fold_bn(params["bn1_g"], params["bn1_b"], params["bn1_m"], params["bn1_v"])
    s2, b2 = _fold_bn(params["bn2_g"], params["bn2_b"], params["bn2_m"], params["bn2_v"])
    h = jnp.einsum("oc,ncm->nom", w1, x) * s1[None, :, None] + b1[None, :, None]
    h = jnp.maximum(h, 0.0)
    h = jnp.einsum("oc,ncm->nom", w2, h) * s2[None, :, None] + b2[None, :, None]
    if C_in != C_out:
        wsc = params["wsc"].reshape(C_out, C_in)
        ssc, bsc = _fold_bn(params["bnsc_g"], params["bnsc_b"],
                            params["bnsc_m"], params["bnsc_v"])
        idn = jnp.einsum("oc,ncm->nom", wsc, x) * ssc[None, :, None] + bsc[None, :, None]
    else:
        idn = x
    out = jnp.maximum(h + idn, 0.0)
    return out.reshape(N, C_out, H, W)


# ----------------------------- param init ------------------------------------

def make_params(key, inplanes, planes):
    ks = jax.random.split(key, 12)
    p = {
        "w1": jax.random.normal(ks[0], (planes, inplanes, 1, 1), jnp.float32) * 0.1,
        "w2": jax.random.normal(ks[1], (planes, planes, 1, 1), jnp.float32) * 0.1,
        "bn1_g": 1.0 + 0.1 * jax.random.normal(ks[2], (planes,), jnp.float32),
        "bn1_b": 0.1 * jax.random.normal(ks[3], (planes,), jnp.float32),
        "bn1_m": 0.1 * jax.random.normal(ks[4], (planes,), jnp.float32),
        "bn1_v": 1.0 + 0.1 * jax.nn.softplus(jax.random.normal(ks[5], (planes,), jnp.float32)),
        "bn2_g": 1.0 + 0.1 * jax.random.normal(ks[6], (planes,), jnp.float32),
        "bn2_b": 0.1 * jax.random.normal(ks[7], (planes,), jnp.float32),
        "bn2_m": 0.1 * jax.random.normal(ks[8], (planes,), jnp.float32),
        "bn2_v": 1.0 + 0.1 * jax.nn.softplus(jax.random.normal(ks[9], (planes,), jnp.float32)),
    }
    if inplanes != planes:
        p["wsc"] = jax.random.normal(ks[10], (planes, inplanes, 1, 1), jnp.float32) * 0.1
        p["bnsc_g"] = jnp.ones((planes,), jnp.float32)
        p["bnsc_b"] = jnp.zeros((planes,), jnp.float32)
        p["bnsc_m"] = 0.05 * jnp.ones((planes,), jnp.float32)
        p["bnsc_v"] = 1.0 + 0.2 * jnp.arange(planes, dtype=jnp.float32) / planes
    return p


# ----------------------------- main -------------------------------------------

if __name__ == "__main__":
    key = jax.random.PRNGKey(0)
    kx, kp1, kp2 = jax.random.split(key, 3)

    # Tolerance accounts for bf16 MXU operands vs. the f32 reference.
    ATOL = RTOL = 2e-2

    # Case 1: inplanes == planes (identity shortcut)
    N, C, Hh, Ww = 2, 4, 16, 16
    x = jax.random.normal(kx, (N, C, Hh, Ww), jnp.float32)
    params = make_params(kp1, C, C)
    out = basic_block_forward(x, params)
    out = jax.block_until_ready(out)
    ref = basic_block_reference(x, params)
    assert out.shape == (N, C, Hh, Ww)
    assert jnp.allclose(out, ref, atol=ATOL, rtol=RTOL), \
        f"identity-path mismatch: max abs err {jnp.max(jnp.abs(out - ref))}"

    # Case 2: inplanes != planes (conv + BN shortcut, fused into conv1 matmul)
    C_in, C_out = 4, 8
    x2 = jax.random.normal(kx, (N, C_in, Hh, Ww), jnp.float32)
    params2 = make_params(kp2, C_in, C_out)
    out2 = basic_block_forward(x2, params2)
    out2 = jax.block_until_ready(out2)
    ref2 = basic_block_reference(x2, params2)
    assert out2.shape == (N, C_out, Hh, Ww)
    assert jnp.allclose(out2, ref2, atol=ATOL, rtol=RTOL), \
        f"shortcut-path mismatch: max abs err {jnp.max(jnp.abs(out2 - ref2))}"

    print("KERNEL_OK")
</pallas_src>

<mosaic_0001>
module attributes {stable_mosaic.version = 11 : i64} {
  func.func @_block_identity_kernel(%arg0: i32, %arg1: i32, %arg2: memref<1x4x256xf32, #tpu.memory_space<vmem>>, %arg3: memref<4x4xbf16, #tpu.memory_space<vmem>>, %arg4: memref<4x1xf32, #tpu.memory_space<vmem>>, %arg5: memref<4x4xbf16, #tpu.memory_space<vmem>>, %arg6: memref<4x1xf32, #tpu.memory_space<vmem>>, %arg7: memref<1x4x256xf32, #tpu.memory_space<vmem>>) attributes {dimension_semantics = [#tpu.dimension_semantics<parallel>, #tpu.dimension_semantics<parallel>], iteration_bounds = array<i64: 2, 1>, scalar_prefetch = 0 : i64, scratch_operands = 0 : i64, tpu.core_type = #tpu.core_type<tc>, window_params = [{transform_indices = @transform_0, window_bounds = array<i64: 1, 4, 256>}, {pipeline_mode = #tpu.pipeline_mode<synchronous>, transform_indices = @transform_1, window_bounds = array<i64: 4, 4>}, {pipeline_mode = #tpu.pipeline_mode<synchronous>, transform_indices = @transform_2, window_bounds = array<i64: 4, 1>}, {pipeline_mode = #tpu.pipeline_mode<synchronous>, transform_indices = @transform_3, window_bounds = array<i64: 4, 4>}, {pipeline_mode = #tpu.pipeline_mode<synchronous>, transform_indices = @transform_4, window_bounds = array<i64: 4, 1>}, {transform_indices = @transform_5, window_bounds = array<i64: 1, 4, 256>}]} {
    %c0 = arith.constant 0 : index
    %c0_0 = arith.constant 0 : index
    %c0_1 = arith.constant 0 : index
    %0 = vector.load %arg2[%c0, %c0_0, %c0_1] : memref<1x4x256xf32, #tpu.memory_space<vmem>>, vector<1x4x256xf32>
    %1 = vector.shape_cast %0 : vector<1x4x256xf32> to vector<4x256xf32>
    %2 = arith.truncf %1 : vector<4x256xf32> to vector<4x256xbf16>
    %c0_2 = arith.constant 0 : index
    %c0_3 = arith.constant 0 : index
    %3 = vector.load %arg3[%c0_2, %c0_3] : memref<4x4xbf16, #tpu.memory_space<vmem>>, vector<4x4xbf16>
    %cst = arith.constant dense<0.000000e+00> : vector<4x256xf32>
    %4 = tpu.matmul %3, %2, %cst {dimension_numbers = #tpu.dot_dimension_numbers<[1], [0], [0], [1], [0, 0, 1, 1], [], []>} : vector<4x4xbf16>, vector<4x256xbf16>, vector<4x256xf32> -> vector<4x256xf32>
    %c0_4 = arith.constant 0 : index
    %c0_5 = arith.constant 0 : index
    %5 = vector.load %arg4[%c0_4, %c0_5] : memref<4x1xf32, #tpu.memory_space<vmem>>, vector<4x1xf32>
    %6 = vector.broadcast %5 : vector<4x1xf32> to vector<4x256xf32>
    %7 = arith.addf %4, %6 : vector<4x256xf32>
    %cst_6 = arith.constant 0.000000e+00 : f32
    %8 = vector.broadcast %cst_6 : f32 to vector<4x256xf32>
    %9 = arith.maximumf %7, %8 : vector<4x256xf32>
    %c0_7 = arith.constant 0 : index
    %c0_8 = arith.constant 0 : index
    %10 = vector.load %arg5[%c0_7, %c0_8] : memref<4x4xbf16, #tpu.memory_space<vmem>>, vector<4x4xbf16>
    %11 = arith.truncf %9 : vector<4x256xf32> to vector<4x256xbf16>
    %cst_9 = arith.constant dense<0.000000e+00> : vector<4x256xf32>
    %12 = tpu.matmul %10, %11, %cst_9 {dimension_numbers = #tpu.dot_dimension_numbers<[1], [0], [0], [1], [0, 0, 1, 1], [], []>} : vector<4x4xbf16>, vector<4x256xbf16>, vector<4x256xf32> -> vector<4x256xf32>
    %c0_10 = arith.constant 0 : index
    %c0_11 = arith.constant 0 : index
    %13 = vector.load %arg6[%c0_10, %c0_11] : memref<4x1xf32, #tpu.memory_space<vmem>>, vector<4x1xf32>
    %14 = vector.broadcast %13 : vector<4x1xf32> to vector<4x256xf32>
    %15 = arith.addf %12, %14 : vector<4x256xf32>
    %16 = arith.addf %15, %1 : vector<4x256xf32>
    %cst_12 = arith.constant 0.000000e+00 : f32
    %17 = vector.broadcast %cst_12 : f32 to vector<4x256xf32>
    %18 = arith.maximumf %16, %17 : vector<4x256xf32>
    %c0_13 = arith.constant 0 : index
    %c0_14 = arith.constant 0 : index
    %c0_15 = arith.constant 0 : index
    %19 = vector.load %arg7[%c0_13, %c0_14, %c0_15] : memref<1x4x256xf32, #tpu.memory_space<vmem>>, vector<1x4x256xf32>
    %20 = vector.shape_cast %19 : vector<1x4x256xf32> to vector<4x256xf32>
    %21 = vector.shape_cast %18 : vector<4x256xf32> to vector<1x4x256xf32>
    tpu.vector_store %arg7[%c0_13, %c0_14, %c0_15], %21 {strides = array<i32>} : memref<1x4x256xf32, #tpu.memory_space<vmem>>, vector<1x4x256xf32>,
    return
  }
  func.func @transform_0(%arg0: i32, %arg1: i32) -> (i32, i32, i32) {
    %c0_i32 = arith.constant 0 : i32
    %c0_i32_0 = arith.constant 0 : i32
    return %arg0, %c0_i32, %arg1 : i32, i32, i32
  }
  func.func @transform_1(%arg0: i32, %arg1: i32) -> (i32, i32) {
    %c0_i32 = arith.constant 0 : i32
    %c0_i32_0 = arith.constant 0 : i32
    %c0_i32_1 = arith.constant 0 : i32
    return %c0_i32, %c0_i32_0 : i32, i32
  }
  func.func @transform_2(%arg0: i32, %arg1: i32) -> (i32, i32) {
    %c0_i32 = arith.constant 0 : i32
    %c0_i32_0 = arith.constant 0 : i32
    %c0_i32_1 = arith.constant 0 : i32
    return %c0_i32, %c0_i32_0 : i32, i32
  }
  func.func @transform_3(%arg0: i32, %arg1: i32) -> (i32, i32) {
    %c0_i32 = arith.constant 0 : i32
    %c0_i32_0 = arith.constant 0 : i32
    %c0_i32_1 = arith.constant 0 : i32
    return %c0_i32, %c0_i32_0 : i32, i32
  }
  func.func @transform_4(%arg0: i32, %arg1: i32) -> (i32, i32) {
    %c0_i32 = arith.constant 0 : i32
    %c0_i32_0 = arith.constant 0 : i32
    %c0_i32_1 = arith.constant 0 : i32
    return %c0_i32, %c0_i32_0 : i32, i32
  }
  func.func @transform_5(%arg0: i32, %arg1: i32) -> (i32, i32, i32) {
    %c0_i32 = arith.constant 0 : i32
    %c0_i32_0 = arith.constant 0 : i32
    return %arg0, %c0_i32, %arg1 : i32, i32, i32
  }
}

</mosaic_0001>

<bundles_post_ra>
// kernel: tpu_custom_call.1
= control target key start
LH: loop header
LB: loop body
LE: loop exit
PB: predicated region body
PF: predicated region fallthrough
CT: control target
= control target key end

     0   :  { %10 = vsyncpa [#allocation3], 0  ;;  %s925_s0 = inlined_call_operand.hbm [shape: f32[2,4,256], index: 0, kind: input, shape index: {}]   ;;  %s926_s1 = inlined_call_operand.vmem [shape: bf16[4,4], index: 1, kind: input, shape index: {}]   ;;  %s927_s2 = inlined_call_operand.vmem [shape: f32[4,1], index: 2, kind: input, shape index: {}]   ;;  %s928_s3 = inlined_call_operand.vmem [shape: bf16[4,4], index: 3, kind: input, shape index: {}]   ;;  %s929_s4 = inlined_call_operand.vmem [shape: f32[4,1], index: 4, kind: input, shape index: {}]   ;;  %s930_s5 = inlined_call_operand.hbm [shape: f32[2,4,256], index: 5, kind: output, shape index: {}]  }
   0x1   :  { %12 = vsyncpa [#allocation3 + $0x1], 0 }
   0x2   :  { %13 = vsyncpa [#allocation4], 0 }
   0x3   :  { %15 = vsyncpa [#allocation4 + $0x1], 0  ;;  %s731_s18 = smov 0   ;;  %s733_s19 = smov 0  }
   0x4   :  { %s735_s20 = smov 0   ;;  %s737_s21 = smov 0  }
   0x5   :  { %s739_s22 = smov 0   ;;  %s741_s23 = smov 0  }
   0x6 LB: > { %s498_s24 = sadd.s32 4294967295, %s696_s23   ;;  %s499_s25 = sadd.s32 4294967294, %s696_s23   ;;  %s696_s23 = sphi %s741_s23, %s21_s23   ;;  %s692_s22 = sphi %s739_s22, %s946_s22   ;;  %s688_s21 = sphi %s737_s21, %s945_s21   ;;  %s684_s20 = sphi %s735_s20, %s944_s20   ;;  %s680_s19 = sphi %s733_s19, %s943_s19   ;;  %s676_s18 = sphi %s731_s18, %s942_s18  }
   0x7   : > { %s33_s26 = sadd.s32 1, %s692_s22  ;;  %s42_s27 = sadd.s32 1, %s684_s20 }
   0x8   : > { %p35_p0 = scmp.ge.s32.totalorder %s33_s26, 2  ;;  %p49_p1 = scmp.ne.s32.totalorder %s684_s20, %s680_s19 }
   0x9   : > { %p50_p2 = scmp.eq.s32.totalorder %s696_s23, 0  ;;  %p55_p3 = scmp.ne.s32.totalorder %s680_s19, %s676_s18 }
   0xa   : > { %s948_s26 = smov (%p35_p0, %s33_s26), 0  ;;  %p56_p5 = scmp.eq.s32.totalorder %s498_s24, 0 }
   0xb   : > { %p772_p4 = por %p50_p2, %p49_p1  ;;  %s37_s29 = ssub.s32 %s692_s22, %s948_s26 }
   0xc   : > { %p165_p6 = scmp.eq.s32.totalorder %s498_s24, 1  ;;  %p40_p7 = scmp.eq.s32.totalorder %s37_s29, 0 }
   0xd   : > { %p778_p8 = por %p56_p5, %p55_p3  ;;  %p171_p10 = scmp.eq.s32.totalorder %s499_s25, 1 }
   0xe   : > { %p782_p9 = por %p165_p6, %p49_p1  ;;  %p531_p13 = scmp.lt.s32.totalorder %s696_s23, 2 }
   0xf   : > { %s787_s7 = scalar_select %p40_p7, %s684_s20, %s42_s27  }
  0x10   : > { %s934_s6 = scalar_select %p782_p9, 1, 0 }
  0x11   : > { %p789_p11 = por %p171_p10, %p55_p3  ;;  %s203_s9 = sand.u32 1, %s684_s20  }
  0x12   : > { %s502_s10 = sshll.u32 %s203_s9, 3  ;;  %s517_s11 = sshll.u32 %s692_s22, 7 }
  0x13   : > { %s935_s8 = scalar_select %p789_p11, 1, 0 }
  0x14   : > { %s800_s14 = scalar_lea.hbm %s925_s0, %s517_s11  ;;  %s207_s15 = scalar_lea.vmem [#allocation2], %s502_s10 }
  0x15   : > { %s217_s16 = sshll.u32 %s207_s15, 4  ;;  %p806_p0 = pnand %p531_p13, %p772_p4  ;;  %s802_s16 = int_to_ptr.vmem [resolvable:$true] %s217_s16 }
  0x16   : > { %s204_s24 = scalar_lea.sflag [#allocation3], %s203_s9  ;;  %s584_s25 = scalar_lea.hbm %s800_s14, 128 }
  0x17   : > { %p585_p3 = scmp.ne.s32.totalorder %s800_s14, %s584_s25  ;;  %p586_p5 = pneg %p806_p0 }
  0x18   : > { %s589_s28 = scalar_lea.hbm %s925_s0, 256  ;;  %p590_p4 = scmp.lt.u32.totalorder %s800_s14, %s925_s0 }
  0x19   : > { %p587_p6 = pnand %p586_p5, %p585_p3  ;;  %p591_p10 = scmp.lt.u32.totalorder %s589_s28, %s584_s25 }
  0x1a   : > { %p593_p12 = scmp.lt.u32.totalorder %s584_s25, %s800_s14 }
  0x1b   : > { %p588_p7 = pneg %p587_p6  ;;  %p592_p13 = por %p591_p10, %p590_p4 }
  0x1d   : > { %p594_p1 = por %p593_p12, %p592_p13 }
  0x1f   : > { %p595_p2 = pnand %p594_p1, %p588_p7 }
  0x21   : > { %598 = shalt.err (!%p595_p2)
}
  0x22   : > { %s599_s9 = scalar_lea.vmem %s802_s16, 128  ;;  %s698_s12 = smov [#allocation2]  }
  0x23   : > { %p600_p3 = scmp.ne.s32.totalorder %s802_s16, %s599_s9  ;;  %s604_s13 = sshll.u32 %s698_s12, 4  ;;  %s605_s13 = int_to_ptr.vmem [resolvable:$false] %s604_s13 }
  0x24   : > { %s606_s15 = scalar_lea.vmem %s605_s13, 256  ;;  %p607_p9 = scmp.lt.s32.totalorder %s802_s16, %s605_s13 }
  0x25   : > { %p602_p6 = pnand %p600_p3, %p586_p5  ;;  %p608_p4 = scmp.lt.s32.totalorder %s606_s15, %s599_s9 }
  0x27   : > { %p603_p11 = pneg %p602_p6  ;;  %p609_p10 = por %p608_p4, %p607_p9 }
  0x29   : > { %p610_p12 = pnand %p609_p10, %p603_p11 }
  0x2b   : > { %613 = shalt.err (!%p610_p12)
}
  0x2c   : > { %526 = dma.hbm_to_vmem [thread:$0]  (!%p806_p0), %s800_s14, 128, %s802_s16, %s204_s24  }
  0x2d   : > { %p937_p1 = scmp.lt.s32.totalorder %s696_s23, 3  ;;  %p938_p2 = scmp.ge.s32.totalorder %s696_s23, 1 }
  0x2f   : > { %p223_p5 = pnand %p938_p2, %p937_p1 }
  0x30   : > { %s842_s25 = sand.u32 (!%p223_p5), 1, %s680_s19  }
  0x31   : > { %226 = sbr.rel (%p223_p5) target bundleno = 524 (0x20c), region = 40  ;;  %s506_s27 = sshll.u32 (!%p223_p5), %s842_s25, 3 }
  0x32   : > { %s229_s29 = scalar_lea.sflag (!%p223_p5), [#allocation3], %s842_s25  ;;  %s232_s17 = scalar_lea.vmem (!%p223_p5), [#allocation2], %s506_s27 }
  0x38   : > { %667 = dma.done.wait (%p778_p8), %s229_s29, 128  }
  0x39   : > { %669 = vsyncadd (%p778_p8), %s229_s29, 4294967168  ;;  %v699_v0 = vmov 0   ;;  %v262_v1 = vld [vmem:[%s232_s17] sm:$0xff]  ;;  %vm279_vm0 = vcmask 1041408   ;;  %vm275_vm1 = vcmask 31744   ;;  %s518_s12 = sshll.u32 %s688_s21, 7 }
  0x3a   : > { %318 = vmatprep.mubr.bf16.mxu0 %v699_v0  ;;  %582 = vset.pattern.permute.xlu0 %v699_v0  ;;  %v269_v2 = vld [vmem:[%s927_s2] sm:$0xf]  ;;  %v264_v3 = vcombine.high %v262_v1, %v262_v1  ;;  %v266_v4 = vpack.c.bf16 %v262_v1, %v262_v1  ;;  %s258_s13 = scalar_lea.vmem [#allocation5], %s506_s27  ;;  %s876_s14 = scalar_lea.hbm %s930_s5, %s518_s12 }
  0x3b   : > { %379 = vmatprep.mubr.bf16.mxu1 %v699_v0  ;;  %272 = vperm.xlu0 %582, %v269_v2   ;;  %v332_v5 = vld [vmem:[%s929_s4] sm:$0xf]  ;;  %s414_s15 = sshll.u32 %s258_s13, 4  ;;  %s398_s16 = scalar_lea.sflag [#allocation4], %s842_s25  ;;  %s878_s15 = int_to_ptr.vmem [resolvable:$true] %s414_s15 }
  0x3c   : > { %v267_v6 = vpack.c.bf16 %v264_v3, %v264_v3  ;;  %v281_v7 = vsel %vm279_vm0, %v266_v4, 0  ;;  %v268_v8 = vld [vmem:[%s926_s1] sm:$0x3]  ;;  %s614_s24 = scalar_lea.vmem %s878_s15, 128  ;;  %p939_p9 = scmp.ne.s32.totalorder %s934_s6, 0 }
  0x3d   : > { %v329_v21 = vld [vmem:[%s928_s3] sm:$0x3]  ;;  %p615_p8 = scmp.ne.s32.totalorder %s878_s15, %s614_s24  ;;  %s700_s21 = smov [#allocation5]  }
  0x3e   : > { %508 = vmatprep.subr.msk.bf16.mxu0 %vm279_vm0, %v267_v6  ;;  %s618_s27 = sshll.u32 %s700_s21, 4  ;;  %s619_s27 = int_to_ptr.vmem [resolvable:$false] %s618_s27 }
  0x3f   : > { %335 = vperm.xlu0 %582, %v332_v5   ;;  %287 = vmatpush1.bf16.msra.mxu0 %v281_v7  ;;  %p616_p11 = pnand %p615_p8, %p939_p9  ;;  %s620_s28 = scalar_lea.vmem %s619_s27, 256 }
  0x40   : > { %p621_p7 = scmp.lt.s32.totalorder %s878_s15, %s619_s27  ;;  %p622_p13 = scmp.lt.s32.totalorder %s620_s28, %s614_s24 }
  0x41   : > { %p617_p0 = pneg %p616_p11 }
  0x42   : > { %509 = vmatmul.mubr.msk.bf16.vlgmr.msra.gmra.mrb[0].mxu0 %vm275_vm1, %v268_v8  ;;  %p623_p3 = por %p622_p13, %p621_p7 }
  0x44   : > { %p624_p6 = pnand %p623_p3, %p617_p0 }
  0xba   : > { %v273_v9 = vpop.permute.xlu0 %272 }
  0xbe   : > { %v336_v22 = vpop.permute.xlu0 %335 }
 0x115   : > { %v320_v10 = vpop.f32.mrb[0].mxu0 }
 0x116   : > { %v321_v11 = vadd.f32 %v320_v10, %v273_v9  ;;  %v322_v12 = vpop.f32.mrb[1].mxu0 }
 0x117   : > { %v323_v13 = vadd.f32 %v322_v12, %v273_v9  ;;  %v324_v14 = vpop.f32.mrb[2].mxu0 }
 0x118   : > { %v327_v15 = vmax.f32 %v321_v11, 0.0  ;;  %v325_v16 = vpop.f32.mrb[3].mxu0 }
 0x119   : > { %v328_v17 = vmax.f32 %v323_v13, 0.0 }
 0x11a   : > { %v330_v18 = vpack.c.bf16 %v327_v15, %v327_v15 }
 0x11b   : > { %v331_v19 = vpack.c.bf16 %v328_v17, %v328_v17 }
 0x11c   : > { %v342_v20 = vsel %vm279_vm0, %v330_v18, 0 }
 0x11d   : > { %510 = vmatprep.subr.msk.bf16.mxu1 %vm279_vm0, %v331_v19 }
 0x11e   : > { %348 = vmatpush1.bf16.msra.mxu1 %v342_v20 }
 0x121   : > { %511 = vmatmul.mubr.msk.bf16.vlgmr.msra.gmra.mrb[0].mxu1 %vm275_vm1, %v329_v21 }
 0x1f4   : > { %v381_v23 = vpop.f32.mrb[0].mxu1 }
 0x1f5   : > { %v382_v24 = vadd.f32 %v381_v23, %v336_v22  ;;  %v383_v25 = vpop.f32.mrb[1].mxu1 }
 0x1f6   : > { %v384_v26 = vadd.f32 %v383_v25, %v336_v22  ;;  %v385_v27 = vpop.f32.mrb[2].mxu1 }
 0x1f7   : > { %v388_v28 = vadd.f32 %v382_v24, %v262_v1  ;;  %v386_v29 = vpop.f32.mrb[3].mxu1 }
 0x1f8   : > { %v389_v30 = vadd.f32 %v384_v26, %v264_v3 }
 0x1f9   : > { %v390_v31 = vmax.f32 %v388_v28, 0.0 }
 0x1fa   : > { %v391_v32 = vmax.f32 %v389_v30, 0.0 }
 0x1fc   : > { %v394_v33 = vcombine.low %v390_v31, %v391_v32 }
 0x1fe   : > { %396 = vst [vmem:[%s258_s13] sm:$0xff] %v394_v33 }
 0x1ff   : > { %627 = shalt.err (!%p624_p6)
}
 0x200   : > { %s628_s25 = scalar_lea.hbm %s876_s14, 128  ;;  %s632_s11 = scalar_lea.hbm %s930_s5, 256 }
 0x201   : > { %p629_p4 = scmp.ne.s32.totalorder %s876_s14, %s628_s25  ;;  %p633_p1 = scmp.lt.u32.totalorder %s876_s14, %s930_s5 }
 0x202   : > { %p634_p2 = scmp.lt.u32.totalorder %s632_s11, %s628_s25  ;;  %p636_p8 = scmp.lt.u32.totalorder %s628_s25, %s876_s14 }
 0x203   : > { %p630_p10 = pnand %p629_p4, %p939_p9 }
 0x204   : > { %p635_p5 = por %p634_p2, %p633_p1 }
 0x205   : > { %p631_p12 = pneg %p630_p10 }
 0x206   : > { %p637_p11 = por %p636_p8, %p635_p5 }
 0x208   : > { %p638_p0 = pnand %p637_p11, %p631_p12 }
 0x20a   : > { %641 = shalt.err (!%p638_p0)
}
 0x20b   : > { %521 = dma.vmem_to_hbm [thread:$0]  (%p939_p9), %s878_s15, 128, %s876_s14, %s398_s16  }
 0x20c PF: > { %s426_s13 = sand.u32 1, %s676_s18   ;;  %p940_p7 = scmp.ne.s32.totalorder %s935_s8, 0 }
 0x20d   : > { %p941_p13 = scmp.ge.s32.totalorder %s696_s23, 2  ;;  %s427_s29 = scalar_lea.sflag [#allocation4], %s426_s13 }
 0x20f   : > { %p528_p3 = pnand %p941_p13, %p940_p7 }
 0x211   : > { %671 = dma.done.wait (!%p528_p3), %s427_s29, 128  }
 0x212   : > { %673 = vsyncadd (!%p528_p3), %s427_s29, 4294967168  ;;  %s21_s23 = sadd.s32 1, %s696_s23   ;;  %s942_s18 = smov %s680_s19 }
 0x213   : > { %p18_p6 = scmp.ge.s32.totalorder %s21_s23, 4   ;;  %s943_s19 = smov %s684_s20 }
 0x214   : > { %s944_s20 = smov %s787_s7  ;;  %s945_s21 = smov %s692_s22 }
 0x215   : > { %s946_s22 = smov %s948_s26  ;;  %20 = sbr.rel (!%p18_p6) target bundleno = 6 (0x6), region = 85 }
 0x21c   :  { %432 = vsyncpa [#allocation3], 1 }
 0x21d   :  { %434 = vsyncpa [#allocation3 + $0x1], 1 }
 0x21e   :  { %435 = vsyncpa [#allocation4], 1 }
 0x21f   :  { %437 = vsyncpa [#allocation4 + $0x1], 1 }

</bundles_post_ra>
